<compile_context>
chip_gen: v5e
topology: v5e:2x2
jax: 0.10.0
libtpu: 0.0.40
codegen_flags: <defaults>
</compile_context>

<pallas_src>
import jax
import jax.numpy as jnp
from jax.experimental import pallas as pl
from jax.experimental.pallas import tpu as pltpu


def _head_kernel(x_ref, w1_ref, b1_ref, gamma_ref, beta_ref, w2_ref, o_ref):
    # x_ref: (tm, H) tile of the flattened (row, head) input.
    x = x_ref[...]
    # x[x == -inf] = 0
    x = jnp.where(x == -jnp.inf, 0.0, x)
    # dense: (tm, H) @ (H, H) + b1   (W1 passed pre-transposed as (in, out))
    h = jnp.dot(x, w1_ref[...], preferred_element_type=jnp.float32) + b1_ref[...]
    # ReLU
    h = jnp.maximum(h, 0.0)
    # LayerNorm over heads: one-pass stats, biased variance, eps=1e-5 (PyTorch default).
    inv_h = 1.0 / h.shape[-1]
    mean = jnp.sum(h, axis=-1, keepdims=True) * inv_h
    ex2 = jnp.sum(h * h, axis=-1, keepdims=True) * inv_h
    var = ex2 - mean * mean
    hn = (h - mean) * jax.lax.rsqrt(var + 1e-5)
    hn = hn * gamma_ref[...] + beta_ref[...]
    # out_proj (H -> 1) as VPU multiply + cross-sublane reduce on the transposed
    # tile, so the tm per-row scores land lane-dense as a single (1, tm) row.
    hn_t = hn.T                                               # (H, tm)  XLU transpose
    scores = jnp.sum(hn_t * w2_ref[...], axis=0, keepdims=True)  # (1, tm)
    o_ref[0] = scores                                         # o_ref block: (1, 1, tm)


_TILE_CANDIDATES = (4096, 2048, 1024, 512, 256, 128)


def _round_up(n, m):
    return ((n + m - 1) // m) * m


@jax.jit
def distance_head(x, w1, b1, gamma, beta, w2, b2):
    """x: (B, S, S, H) f32. w1: (H, H) pre-transposed (in, out). w2: (H, 1). b2: (1,)."""
    B, S, S2, H = x.shape
    assert S == S2
    rows = B * S * S
    xf = x.reshape(rows, H)

    # Largest 128-multiple tile that divides the row count (cap 4096 rows:
    # ~512 KiB / tile for H=32, comfortably double-buffered in VMEM on v5e/v6e/v7x).
    tm = next((c for c in _TILE_CANDIDATES if rows % c == 0), None)
    if tm is None:
        # Rare ragged case: pad the row count (one extra copy of x).
        # TODO(synk): masked tail block instead of padding for ragged row counts.
        rows_p = _round_up(rows, 512)
        xf = jnp.pad(xf, ((0, rows_p - rows), (0, 0)))
        tm = next(c for c in _TILE_CANDIDATES if rows_p % c == 0)
    else:
        rows_p = rows
    n_steps = rows_p // tm

    scores = pl.pallas_call(
        _head_kernel,
        out_shape=jax.ShapeDtypeStruct((n_steps, 1, tm), jnp.float32),
        grid_spec=pltpu.PrefetchScalarGridSpec(
            num_scalar_prefetch=0,
            grid=(n_steps,),
            in_specs=[
                pl.BlockSpec((tm, H), lambda i: (i, 0)),   # x row tile
                pl.BlockSpec((H, H), lambda i: (0, 0)),    # W1 (constant block: not re-DMA'd)
                pl.BlockSpec((1, H), lambda i: (0, 0)),    # b1
                pl.BlockSpec((1, H), lambda i: (0, 0)),    # gamma
                pl.BlockSpec((1, H), lambda i: (0, 0)),    # beta
                pl.BlockSpec((H, 1), lambda i: (0, 0)),    # W2
            ],
            out_specs=pl.BlockSpec((1, 1, tm), lambda i: (i, 0, 0)),  # lane-dense rows
        ),
        compiler_params=pltpu.CompilerParams(
            dimension_semantics=("parallel",)),
    )(xf, w1, b1.reshape(1, H), gamma.reshape(1, H), beta.reshape(1, H), w2)

    # Bias + symmetrize in XLA (fuses into one cheap pass; avoids a second
    # full (S, S)-block kernel that would blow VMEM for large S).
    s = scores.reshape(rows_p)[:rows].reshape(B, S, S) + b2[0]
    return (s + jnp.swapaxes(s, -1, -2)) * 0.5


def _reference(x, w1, b1, gamma, beta, w2, b2):
    # Pure-JAX reference matching the PyTorch forward.
    x = jnp.where(x == -jnp.inf, 0.0, x)
    h = jnp.maximum(x @ w1 + b1, 0.0)
    mean = jnp.mean(h, axis=-1, keepdims=True)
    var = jnp.mean((h - mean) ** 2, axis=-1, keepdims=True)
    hn = (h - mean) / jnp.sqrt(var + 1e-5) * gamma + beta
    s = jnp.sum(hn * w2[:, 0], axis=-1) + b2[0]
    return (s + jnp.swapaxes(s, -1, -2)) * 0.5


if __name__ == "__main__":
    B, S, H = 2, 8, 32  # bsz, seq_len, heads

    key = jax.random.PRNGKey(0)
    kx, kw1, kb1, kw2, kb2 = jax.random.split(key, 5)

    x = jax.random.normal(kx, (B, S, S, H), dtype=jnp.float32)
    # Sprinkle in some -inf entries (the module masks them to zero).
    mask = jax.random.bernoulli(kx, 0.05, (B, S, S, H))
    x = jnp.where(mask, -jnp.inf, x)

    # Deterministic parameter init (synthetic, not a checkpoint load).
    # Stored pre-transposed: w1 is (H_in, H_out), w2 is (H_in, 1).
    w1 = jax.random.normal(kw1, (H, H), dtype=jnp.float32) * (1.0 / jnp.sqrt(H))
    b1 = jax.random.normal(kb1, (H,), dtype=jnp.float32) * 0.01
    gamma = jnp.ones((H,), dtype=jnp.float32)
    beta = jnp.zeros((H,), dtype=jnp.float32)
    w2 = jax.random.normal(kw2, (H, 1), dtype=jnp.float32) * (1.0 / jnp.sqrt(H))
    b2 = jax.random.normal(kb2, (1,), dtype=jnp.float32) * 0.01

    out = distance_head(x, w1, b1, gamma, beta, w2, b2)
    out = jax.block_until_ready(out)

    ref = _reference(x, w1, b1, gamma, beta, w2, b2)
    assert out.shape == (B, S, S)
    # Tolerance leaves headroom for TPU default (bf16-pass) matmul precision
    # differences between the in-kernel dot and the XLA reference dot.
    assert jnp.allclose(out, ref, atol=1e-3, rtol=1e-3), "mismatch vs reference"

    print("KERNEL_OK")
</pallas_src>

<mosaic_0001>
module attributes {stable_mosaic.version = 11 : i64} {
  func.func @_head_kernel(%arg0: i32, %arg1: memref<128x32xf32, #tpu.memory_space<vmem>>, %arg2: memref<32x32xf32, #tpu.memory_space<vmem>>, %arg3: memref<1x32xf32, #tpu.memory_space<vmem>>, %arg4: memref<1x32xf32, #tpu.memory_space<vmem>>, %arg5: memref<1x32xf32, #tpu.memory_space<vmem>>, %arg6: memref<32x1xf32, #tpu.memory_space<vmem>>, %arg7: memref<1x1x128xf32, #tpu.memory_space<vmem>>) attributes {dimension_semantics = [#tpu.dimension_semantics<parallel>], iteration_bounds = array<i64: 1>, scalar_prefetch = 0 : i64, scratch_operands = 0 : i64, tpu.core_type = #tpu.core_type<tc>, window_params = [{transform_indices = @transform_0, window_bounds = array<i64: 128, 32>}, {pipeline_mode = #tpu.pipeline_mode<synchronous>, transform_indices = @transform_1, window_bounds = array<i64: 32, 32>}, {pipeline_mode = #tpu.pipeline_mode<synchronous>, transform_indices = @transform_2, window_bounds = array<i64: 1, 32>}, {pipeline_mode = #tpu.pipeline_mode<synchronous>, transform_indices = @transform_3, window_bounds = array<i64: 1, 32>}, {pipeline_mode = #tpu.pipeline_mode<synchronous>, transform_indices = @transform_4, window_bounds = array<i64: 1, 32>}, {pipeline_mode = #tpu.pipeline_mode<synchronous>, transform_indices = @transform_5, window_bounds = array<i64: 32, 1>}, {transform_indices = @transform_6, window_bounds = array<i64: 1, 1, 128>}]} {
    %c0 = arith.constant 0 : index
    %c0_0 = arith.constant 0 : index
    %0 = vector.load %arg1[%c0, %c0_0] : memref<128x32xf32, #tpu.memory_space<vmem>>, vector<128x32xf32>
    %cst = arith.constant 0xFF800000 : f32
    %1 = vector.broadcast %cst : f32 to vector<128x32xf32>
    %2 = arith.cmpf oeq, %0, %1 : vector<128x32xf32>
    %cst_1 = arith.constant 0.000000e+00 : f32
    %3 = vector.broadcast %cst_1 : f32 to vector<128x32xf32>
    %4 = arith.select %2, %3, %0 : vector<128x32xi1>, vector<128x32xf32>
    %c0_2 = arith.constant 0 : index
    %c0_3 = arith.constant 0 : index
    %5 = vector.load %arg2[%c0_2, %c0_3] : memref<32x32xf32, #tpu.memory_space<vmem>>, vector<32x32xf32>
    %cst_4 = arith.constant dense<0.000000e+00> : vector<128x32xf32>
    %6 = tpu.matmul %4, %5, %cst_4 {dimension_numbers = #tpu.dot_dimension_numbers<[1], [0], [0], [1], [0, 0, 1, 1], [], []>} : vector<128x32xf32>, vector<32x32xf32>, vector<128x32xf32> -> vector<128x32xf32>
    %c0_5 = arith.constant 0 : index
    %c0_6 = arith.constant 0 : index
    %7 = vector.load %arg3[%c0_5, %c0_6] : memref<1x32xf32, #tpu.memory_space<vmem>>, vector<1x32xf32>
    %8 = vector.broadcast %7 : vector<1x32xf32> to vector<128x32xf32>
    %9 = arith.addf %6, %8 : vector<128x32xf32>
    %cst_7 = arith.constant 0.000000e+00 : f32
    %10 = vector.broadcast %cst_7 : f32 to vector<128x32xf32>
    %11 = arith.maximumf %9, %10 : vector<128x32xf32>
    %cst_8 = arith.constant dense<0.000000e+00> : vector<128xf32>
    %12 = vector.multi_reduction <add>, %11, %cst_8 [1] : vector<128x32xf32> to vector<128xf32>
    %13 = vector.shape_cast %12 : vector<128xf32> to vector<128x1xf32>
    %cst_9 = arith.constant 3.125000e-02 : f32
    %14 = vector.broadcast %cst_9 : f32 to vector<128x1xf32>
    %15 = arith.mulf %13, %14 : vector<128x1xf32>
    %16 = arith.mulf %11, %11 : vector<128x32xf32>
    %cst_10 = arith.constant dense<0.000000e+00> : vector<128xf32>
    %17 = vector.multi_reduction <add>, %16, %cst_10 [1] : vector<128x32xf32> to vector<128xf32>
    %18 = vector.shape_cast %17 : vector<128xf32> to vector<128x1xf32>
    %cst_11 = arith.constant 3.125000e-02 : f32
    %19 = vector.broadcast %cst_11 : f32 to vector<128x1xf32>
    %20 = arith.mulf %18, %19 : vector<128x1xf32>
    %21 = arith.mulf %15, %15 : vector<128x1xf32>
    %22 = arith.subf %20, %21 : vector<128x1xf32>
    %23 = vector.broadcast %15 : vector<128x1xf32> to vector<128x32xf32>
    %24 = arith.subf %11, %23 : vector<128x32xf32>
    %cst_12 = arith.constant 9.99999974E-6 : f32
    %25 = vector.broadcast %cst_12 : f32 to vector<128x1xf32>
    %26 = arith.addf %22, %25 : vector<128x1xf32>
    %27 = math.rsqrt %26 : vector<128x1xf32>
    %28 = vector.broadcast %27 : vector<128x1xf32> to vector<128x32xf32>
    %29 = arith.mulf %24, %28 : vector<128x32xf32>
    %c0_13 = arith.constant 0 : index
    %c0_14 = arith.constant 0 : index
    %30 = vector.load %arg4[%c0_13, %c0_14] : memref<1x32xf32, #tpu.memory_space<vmem>>, vector<1x32xf32>
    %31 = vector.broadcast %30 : vector<1x32xf32> to vector<128x32xf32>
    %32 = arith.mulf %29, %31 : vector<128x32xf32>
    %c0_15 = arith.constant 0 : index
    %c0_16 = arith.constant 0 : index
    %33 = vector.load %arg5[%c0_15, %c0_16] : memref<1x32xf32, #tpu.memory_space<vmem>>, vector<1x32xf32>
    %34 = vector.broadcast %33 : vector<1x32xf32> to vector<128x32xf32>
    %35 = arith.addf %32, %34 : vector<128x32xf32>
    %36 = tpu.transpose %35, [1, 0] : vector<128x32xf32> -> vector<32x128xf32>
    %c0_17 = arith.constant 0 : index
    %c0_18 = arith.constant 0 : index
    %37 = vector.load %arg6[%c0_17, %c0_18] : memref<32x1xf32, #tpu.memory_space<vmem>>, vector<32x1xf32>
    %38 = vector.broadcast %37 : vector<32x1xf32> to vector<32x128xf32>
    %39 = arith.mulf %36, %38 : vector<32x128xf32>
    %cst_19 = arith.constant dense<0.000000e+00> : vector<128xf32>
    %40 = vector.multi_reduction <add>, %39, %cst_19 [0] : vector<32x128xf32> to vector<128xf32>
    %41 = vector.shape_cast %40 : vector<128xf32> to vector<1x128xf32>
    %c0_20 = arith.constant 0 : index
    %c0_21 = arith.constant 0 : index
    %c0_22 = arith.constant 0 : index
    %42 = vector.load %arg7[%c0_20, %c0_21, %c0_22] : memref<1x1x128xf32, #tpu.memory_space<vmem>>, vector<1x1x128xf32>
    %43 = vector.shape_cast %42 : vector<1x1x128xf32> to vector<1x128xf32>
    %44 = vector.shape_cast %41 : vector<1x128xf32> to vector<1x1x128xf32>
    tpu.vector_store %arg7[%c0_20, %c0_21, %c0_22], %44 {strides = array<i32>} : memref<1x1x128xf32, #tpu.memory_space<vmem>>, vector<1x1x128xf32>,
    return
  }
  func.func @transform_0(%arg0: i32) -> (i32, i32) {
    %c0_i32 = arith.constant 0 : i32
    %c0_i32_0 = arith.constant 0 : i32
    return %arg0, %c0_i32 : i32, i32
  }
  func.func @transform_1(%arg0: i32) -> (i32, i32) {
    %c0_i32 = arith.constant 0 : i32
    %c0_i32_0 = arith.constant 0 : i32
    %c0_i32_1 = arith.constant 0 : i32
    return %c0_i32, %c0_i32_0 : i32, i32
  }
  func.func @transform_2(%arg0: i32) -> (i32, i32) {
    %c0_i32 = arith.constant 0 : i32
    %c0_i32_0 = arith.constant 0 : i32
    %c0_i32_1 = arith.constant 0 : i32
    return %c0_i32, %c0_i32_0 : i32, i32
  }
  func.func @transform_3(%arg0: i32) -> (i32, i32) {
    %c0_i32 = arith.constant 0 : i32
    %c0_i32_0 = arith.constant 0 : i32
    %c0_i32_1 = arith.constant 0 : i32
    return %c0_i32, %c0_i32_0 : i32, i32
  }
  func.func @transform_4(%arg0: i32) -> (i32, i32) {
    %c0_i32 = arith.constant 0 : i32
    %c0_i32_0 = arith.constant 0 : i32
    %c0_i32_1 = arith.constant 0 : i32
    return %c0_i32, %c0_i32_0 : i32, i32
  }
  func.func @transform_5(%arg0: i32) -> (i32, i32) {
    %c0_i32 = arith.constant 0 : i32
    %c0_i32_0 = arith.constant 0 : i32
    %c0_i32_1 = arith.constant 0 : i32
    return %c0_i32, %c0_i32_0 : i32, i32
  }
  func.func @transform_6(%arg0: i32) -> (i32, i32, i32) {
    %c0_i32 = arith.constant 0 : i32
    %c0_i32_0 = arith.constant 0 : i32
    %c0_i32_1 = arith.constant 0 : i32
    return %arg0, %c0_i32, %c0_i32_0 : i32, i32, i32
  }
}

</mosaic_0001>

<bundles_post_ra>
// kernel: distance_head.1
= control target key start
LH: loop header
LB: loop body
LE: loop exit
PB: predicated region body
PF: predicated region fallthrough
CT: control target
= control target key end

     0   :  { %11 = vsyncpa [#allocation3], 0  ;;  %s819_s24 = smov [#allocation2]   ;;  %s820_s26 = smov 128   ;;  %s1306_s0 = inlined_call_operand.hbm [shape: f32[128,32], index: 0, kind: input, shape index: {}]   ;;  %s1307_s1 = inlined_call_operand.vmem [shape: f32[32,32], index: 1, kind: input, shape index: {}]   ;;  %s1308_s2 = inlined_call_operand.vmem [shape: f32[1,32], index: 2, kind: input, shape index: {}]   ;;  %s1309_s3 = inlined_call_operand.vmem [shape: f32[1,32], index: 3, kind: input, shape index: {}]   ;;  %s1310_s4 = inlined_call_operand.vmem [shape: f32[1,32], index: 4, kind: input, shape index: {}]   ;;  %s1311_s5 = inlined_call_operand.vmem [shape: f32[32,1], index: 5, kind: input, shape index: {}]   ;;  %s1312_s6 = inlined_call_operand.vmem [shape: f32[1,1,128], index: 6, kind: output, shape index: {}]  }
   0x1   :  { %s16_s23 = sshll.u32 %s1306_s0, 4  ;;  %s18_s25 = sshll.u32 %s819_s24, 4  ;;  %s17_s23 = int_to_ptr.hbm [resolvable:$true] %s16_s23  ;;  %s19_s25 = int_to_ptr.vmem [resolvable:$true] %s18_s25 }
   0x2   :  { %s821_s27 = smov 8  }
   0x3   :  { %24 = dma.hbm_to_vmem [thread:$0]  %s17_s23, 2048, %s19_s25, [#allocation3], %s820_s26, %s820_s26, %s821_s27  }
   0x4   :  { %817 = dma.done.wait [#allocation3], 2048  }
   0x5   :  { %818 = vsyncadd [#allocation3], 4294965248  ;;  %v90_v0 = vld [vmem:[%s1307_s1 + $0x18] sm:$0xff]  ;;  %v89_v1 = vld [vmem:[%s1307_s1 + $0x10] sm:$0xff]  ;;  %vm95_vm3 = vcmask 261120  }
   0x6   :  { %156 = vmatpush.msra.mxu0 %v90_v0  ;;  %740 = vmatpush.msra.mxu1 %v90_v0  ;;  %v39_v2 = vld [vmem:[#allocation2] sm:$0xff]  ;;  %v88_v4 = vld [vmem:[%s1307_s1 + $0x8] sm:$0xff]  ;;  %v41_v19 = vld [vmem:[#allocation2 + $0x10] sm:$0xff] }
   0x7   :  { %v43_v3 = vld [vmem:[#allocation2 + $0x20] sm:$0xff]  ;;  %742 = vmatpush.msra.mxu3 %v90_v0  ;;  %741 = vmatpush.msra.mxu2 %v90_v0  ;;  %vm55_vm0 = vcmp.eq.f32.partialorder %v39_v2, -inf  ;;  %v40_v11 = vld [vmem:[#allocation2 + $0x8] sm:$0xff]  ;;  %v53_v21 = vld [vmem:[#allocation2 + $0x70] sm:$0xff]  ;;  %vm57_vm9 = vcmp.eq.f32.partialorder %v41_v19, -inf }
   0x8   :  { %v51_v5 = vld [vmem:[#allocation2 + $0x60] sm:$0xff]  ;;  %157 = vmatpush.msra.mxu0 %v89_v1  ;;  %743 = vmatpush.msra.mxu1 %v89_v1  ;;  %vm59_vm1 = vcmp.eq.f32.partialorder %v43_v3, -inf  ;;  %v71_v8 = vsel %vm55_vm0, 0.0, %v39_v2  ;;  %v52_v13 = vld [vmem:[#allocation2 + $0x68] sm:$0xff]  ;;  %vm56_vm5 = vcmp.eq.f32.partialorder %v40_v11, -inf  ;;  %v45_v22 = vld [vmem:[#allocation2 + $0x30] sm:$0xff] }
   0x9   :  { %v47_v6 = vld [vmem:[#allocation2 + $0x40] sm:$0xff]  ;;  %vm67_vm2 = vcmp.eq.f32.partialorder %v51_v5, -inf  ;;  %745 = vmatpush.msra.mxu3 %v89_v1  ;;  %744 = vmatpush.msra.mxu2 %v89_v1  ;;  %v75_v9 = vsel %vm59_vm1, 0.0, %v43_v3  ;;  %v44_v14 = vld [vmem:[#allocation2 + $0x28] sm:$0xff]  ;;  %vm68_vm6 = vcmp.eq.f32.partialorder %v52_v13, -inf  ;;  %v72_v16 = vsel %vm56_vm5, 0.0, %v40_v11 }
   0xa   :  { %v87_v7 = vld [vmem:[%s1307_s1] sm:$0xff]  ;;  %158 = vmatpush.msra.mxu0 %v88_v4  ;;  %746 = vmatpush.msra.mxu1 %v88_v4  ;;  %vm63_vm4 = vcmp.eq.f32.partialorder %v47_v6, -inf  ;;  %v83_v10 = vsel %vm67_vm2, 0.0, %v51_v5  ;;  %v48_v15 = vld [vmem:[#allocation2 + $0x48] sm:$0xff]  ;;  %vm60_vm7 = vcmp.eq.f32.partialorder %v44_v14, -inf  ;;  %v84_v17 = vsel %vm68_vm6, 0.0, %v52_v13 }
   0xb   :  { %748 = vmatpush.msra.mxu3 %v88_v4  ;;  %747 = vmatpush.msra.mxu2 %v88_v4  ;;  %v79_v12 = vsel %vm63_vm4, 0.0, %v47_v6  ;;  %vm64_vm8 = vcmp.eq.f32.partialorder %v48_v15, -inf  ;;  %v76_v18 = vsel %vm60_vm7, 0.0, %v44_v14  ;;  %v49_v23 = vld [vmem:[#allocation2 + $0x50] sm:$0xff]  ;;  %vm69_vm10 = vcmp.eq.f32.partialorder %v53_v21, -inf  ;;  %v42_v27 = vld [vmem:[#allocation2 + $0x18] sm:$0xff] }
   0xc   :  { %159 = vmatpush.msra.mxu0 %v87_v7  ;;  %749 = vmatpush.msra.mxu1 %v87_v7  ;;  %v80_v20 = vsel %vm64_vm8, 0.0, %v48_v15  ;;  %vm61_vm11 = vcmp.eq.f32.partialorder %v45_v22, -inf  ;;  %v73_v24 = vsel %vm57_vm9, 0.0, %v41_v19  ;;  %vm65_vm12 = vcmp.eq.f32.partialorder %v49_v23, -inf  ;;  %v46_v29 = vld [vmem:[#allocation2 + $0x38] sm:$0xff] }
   0xd   :  { %751 = vmatpush.msra.mxu3 %v87_v7  ;;  %724 = vmatmul.msk.f32.vlgmr.msra.gmra.mxu0 %vm95_vm3, %v71_v8  ;;  %v85_v25 = vsel %vm69_vm10, 0.0, %v53_v21  ;;  %v77_v26 = vsel %vm61_vm11, 0.0, %v45_v22  ;;  %v81_v28 = vsel %vm65_vm12, 0.0, %v49_v23  ;;  %v54_v30 = vld [vmem:[#allocation2 + $0x78] sm:$0xff]  ;;  %vm58_vm13 = vcmp.eq.f32.partialorder %v42_v27, -inf }
   0xe   :  { %728 = vmatmul.msk.f32.vlgmr.msra.gmra.mxu1 %vm95_vm3, %v75_v9  ;;  %736 = vmatmul.msk.f32.vlgmr.msra.gmra.mxu3 %vm95_vm3, %v83_v10  ;;  %v50_v31 = vld [vmem:[#allocation2 + $0x58] sm:$0xff]  ;;  %vm62_vm14 = vcmp.eq.f32.partialorder %v46_v29, -inf  ;;  %vm70_vm15 = vcmp.eq.f32.partialorder %v54_v30, -inf  ;;  %v74_v32 = vsel %vm58_vm13, 0.0, %v42_v27  ;;  %v892_v36 = vld [vmem:[%s1308_s2] ss:$0 sm:$0xff] }
   0xf   :  { %750 = vmatpush.msra.mxu2 %v87_v7  ;;  %vm66_vm0 = vcmp.eq.f32.partialorder %v50_v31, -inf  ;;  %v78_v33 = vsel %vm62_vm14, 0.0, %v46_v29  ;;  %v86_v34 = vsel %vm70_vm15, 0.0, %v54_v30 }
  0x10   :  { %732 = vmatmul.msk.f32.vlgmr.msra.gmra.mxu2 %vm95_vm3, %v79_v12  ;;  %v82_v35 = vsel %vm66_vm0, 0.0, %v50_v31 }
  0x15   :  { %725 = vmatmul.msk.f32.gmra.mxu0 %vm95_vm3, %v72_v16 }
  0x16   :  { %737 = vmatmul.msk.f32.gmra.mxu3 %vm95_vm3, %v84_v17  ;;  %729 = vmatmul.msk.f32.gmra.mxu1 %vm95_vm3, %v76_v18 }
  0x18   :  { %733 = vmatmul.msk.f32.gmra.mxu2 %vm95_vm3, %v80_v20 }
  0x1d   :  { %726 = vmatmul.msk.f32.gmra.mxu0 %vm95_vm3, %v73_v24 }
  0x1e   :  { %738 = vmatmul.msk.f32.gmra.mxu3 %vm95_vm3, %v85_v25  ;;  %730 = vmatmul.msk.f32.gmra.mxu1 %vm95_vm3, %v77_v26 }
  0x20   :  { %734 = vmatmul.msk.f32.gmra.mxu2 %vm95_vm3, %v81_v28 }
  0x25   :  { %727 = vmatmul.msk.f32.gmra.mxu0 %vm95_vm3, %v74_v32 }
  0x26   :  { %731 = vmatmul.msk.f32.gmra.mxu1 %vm95_vm3, %v78_v33  ;;  %739 = vmatmul.msk.f32.gmra.mxu3 %vm95_vm3, %v86_v34 }
  0x28   :  { %735 = vmatmul.msk.f32.gmra.mxu2 %vm95_vm3, %v82_v35 }
  0x8a   :  { %v161_v37 = vpop.f32.mrf.mxu0 }
  0x8b   :  { %v162_v38 = vadd.f32 %v892_v36, %v161_v37  ;;  %v173_v39 = vpop.f32.mrf.mxu1 }
  0x8c   :  { %v174_v40 = vadd.f32 %v892_v36, %v173_v39 }
  0x8d   :  { %v896_v41 = vmax.f32 %v162_v38, 0.0 }
  0x8e   :  { %v898_v42 = vmax.f32 %v174_v40, 0.0 }
  0x8f   :  { %v225_v43 = vsel %vm95_vm3, %v896_v41, 0.0  ;;  %v289_v44 = vmul.f32 %v896_v41, %v896_v41 }
  0x90   :  { %v237_v45 = vsel %vm95_vm3, %v898_v42, 0.0  ;;  %226 = vadd.xlane.f32.xlu0 %v225_v43  ;;  %v293_v32 = vmul.f32 %v898_v42, %v898_v42 }
  0x91   :  { %v197_v46 = vpop.f32.mrf.mxu3  ;;  %238 = vadd.xlane.f32.xlu2 %v237_v45  ;;  %v305_v47 = vsel %vm95_vm3, %v289_v44, 0.0 }
  0x92   :  { %v198_v48 = vadd.f32 %v892_v36, %v197_v46  ;;  %306 = vadd.xlane.f32.xlu1 %v305_v47  ;;  %v164_v49 = vpop.f32.mrf.mxu0  ;;  %v317_v35 = vsel %vm95_vm3, %v293_v32, 0.0 }
  0x93   :  { %v185_v50 = vpop.f32.mrf.mxu2  ;;  %v176_v51 = vpop.f32.mrf.mxu1  ;;  %v165_v56 = vadd.f32 %v892_v36, %v164_v49 }
  0x94   :  { %v908_v52 = vmax.f32 %v198_v48, 0.0  ;;  %v186_v53 = vadd.f32 %v892_v36, %v185_v50  ;;  %v177_v55 = vadd.f32 %v892_v36, %v176_v51 }
  0x95   :  { %v922_v63 = vmax.f32 %v165_v56, 0.0 }
  0x96   :  { %v911_v54 = vmax.f32 %v186_v53, 0.0  ;;  %v261_v57 = vsel %vm95_vm3, %v908_v52, 0.0  ;;  %v920_v61 = vmax.f32 %v177_v55, 0.0 }
  0x97   :  { %v228_v6 = vsel %vm95_vm3, %v922_v63, 0.0  ;;  %v290_v14 = vmul.f32 %v922_v63, %v922_v63 }
  0x98   :  { %v249_v58 = vsel %vm95_vm3, %v911_v54, 0.0  ;;  %262 = vadd.xlane.f32.xlu0 %v261_v57  ;;  %v240_v4 = vsel %vm95_vm3, %v920_v61, 0.0  ;;  %v294_v37 = vmul.f32 %v920_v61, %v920_v61  ;;  %v297_v46 = vmul.f32 %v911_v54, %v911_v54 }
  0x99   :  { %v200_v59 = vpop.f32.mrf.mxu3  ;;  %250 = vadd.xlane.f32.xlu2 %v249_v58  ;;  %v308_v19 = vsel %vm95_vm3, %v290_v14, 0.0 }
  0x9a   :  { %v201_v60 = vadd.f32 %v892_v36, %v200_v59  ;;  %v167_v62 = vpop.f32.mrf.mxu0  ;;  %v320_v40 = vsel %vm95_vm3, %v294_v37, 0.0  ;;  %v329_v53 = vsel %vm95_vm3, %v297_v46, 0.0  ;;  %v1034_v46 = vld [vmem:[%s1309_s3] ss:$0 sm:$0xff] }
  0x9b   :  { %v188_v0 = vpop.f32.mrf.mxu2  ;;  %v168_v2 = vadd.f32 %v892_v36, %v167_v62  ;;  %v179_v8 = vpop.f32.mrf.mxu1 }
  0x9c   :  { %v924_v1 = vmax.f32 %v201_v60, 0.0  ;;  %v189_v5 = vadd.f32 %v892_v36, %v188_v0  ;;  %v180_v15 = vadd.f32 %v892_v36, %v179_v8 }
  0x9d   :  { %v934_v7 = vmax.f32 %v168_v2, 0.0 }
  0x9e   :  { %v264_v3 = vsel %vm95_vm3, %v924_v1, 0.0  ;;  %v936_v9 = vmax.f32 %v189_v5, 0.0  ;;  %v950_v20 = vmax.f32 %v180_v15, 0.0  ;;  %v302_v2 = vmul.f32 %v924_v1, %v924_v1 }
  0x9f   :  { %265 = vadd.xlane.f32.xlu1 %v264_v3  ;;  %v231_v12 = vsel %vm95_vm3, %v934_v7, 0.0  ;;  %v291_v29 = vmul.f32 %v934_v7, %v934_v7 }
  0xa0   :  { %229 = vadd.xlane.f32.xlu0 %v228_v6  ;;  %v252_v17 = vsel %vm95_vm3, %v936_v9, 0.0  ;;  %v243_v25 = vsel %vm95_vm3, %v950_v20, 0.0  ;;  %v295_v58 = vmul.f32 %v950_v20, %v950_v20  ;;  %v298_v0 = vmul.f32 %v936_v9, %v936_v9 }
  0xa1   :  { %241 = vadd.xlane.f32.xlu2 %v240_v4  ;;  %v203_v11 = vpop.f32.mrf.mxu3  ;;  %v311_v33 = vsel %vm95_vm3, %v291_v29, 0.0  ;;  %v344_v5 = vsel %vm95_vm3, %v302_v2, 0.0  ;;  %v301_v6 = vmul.f32 %v908_v52, %v908_v52 }
  0xa2   :  { %v204_v16 = vadd.f32 %v892_v36, %v203_v11  ;;  %v170_v21 = vpop.f32.mrf.mxu0  ;;  %v323_v60 = vsel %vm95_vm3, %v295_v58, 0.0  ;;  %v332_v4 = vsel %vm95_vm3, %v298_v0, 0.0 }
  0xa3   :  { %v191_v10 = vpop.f32.mrf.mxu2  ;;  %v171_v24 = vadd.f32 %v892_v36, %v170_v21  ;;  %v182_v28 = vpop.f32.mrf.mxu1 }
  0xa4   :  { %v192_v13 = vadd.f32 %v892_v36, %v191_v10  ;;  %v952_v22 = vmax.f32 %v204_v16, 0.0  ;;  %v183_v31 = vadd.f32 %v892_v36, %v182_v28  ;;  %v341_v10 = vsel %vm95_vm3, %v301_v6, 0.0 }
  0xa5   :  { %v961_v27 = vmax.f32 %v171_v24, 0.0 }
  0xa6   :  { %v947_v18 = vmax.f32 %v192_v13, 0.0  ;;  %v267_v26 = vsel %vm95_vm3, %v952_v22, 0.0  ;;  %v971_v34 = vmax.f32 %v183_v31, 0.0  ;;  %v303_v8 = vmul.f32 %v952_v22, %v952_v22 }
  0xa7   :  { %232 = vadd.xlane.f32.xlu1 %v231_v12  ;;  %v234_v30 = vsel %vm95_vm3, %v961_v27, 0.0  ;;  %v292_v44 = vmul.f32 %v961_v27, %v961_v27 }
  0xa8   :  { %253 = vadd.xlane.f32.xlu0 %v252_v17  ;;  %v255_v23 = vsel %vm95_vm3, %v947_v18, 0.0  ;;  %v246_v38 = vsel %vm95_vm3, %v971_v34, 0.0  ;;  %v299_v39 = vmul.f32 %v947_v18, %v947_v18  ;;  %v296_v48 = vmul.f32 %v971_v34, %v971_v34 }
  0xa9   :  { %309 = vadd.xlane.f32.xlu2 %v308_v19  ;;  %v206_v45 = vpop.f32.mrf.mxu3  ;;  %v314_v50 = vsel %vm95_vm3, %v292_v44, 0.0  ;;  %v347_v11 = vsel %vm95_vm3, %v303_v8, 0.0 }
  0xaa   :  { %v335_v43 = vsel %vm95_vm3, %v299_v39, 0.0  ;;  %v207_v49 = vadd.f32 %v892_v36, %v206_v45  ;;  %v326_v55 = vsel %vm95_vm3, %v296_v48, 0.0 }
  0xab   :  { %v194_v47 = vpop.f32.mrf.mxu2 }
  0xac   :  { %v195_v51 = vadd.f32 %v892_v36, %v194_v47  ;;  %v993_v56 = vmax.f32 %v207_v49, 0.0 }
  0xae   :  { %v995_v57 = vmax.f32 %v195_v51, 0.0  ;;  %v270_v59 = vsel %vm95_vm3, %v993_v56, 0.0  ;;  %v304_v12 = vmul.f32 %v993_v56, %v993_v56  ;;  %v1039_v51 = vld [vmem:[%s1310_s4] ss:$0 sm:$0xff] }
  0xaf   :  { %256 = vadd.xlane.f32.xlu1 %v255_v23 }
  0xb0   :  { %244 = vadd.xlane.f32.xlu0 %v243_v25  ;;  %v258_v36 = vsel %vm95_vm3, %v995_v57, 0.0  ;;  %v300_v62 = vmul.f32 %v995_v57, %v995_v57  ;;  %v350_v13 = vsel %vm95_vm3, %v304_v12, 0.0 }
  0xb1   :  { %268 = vadd.xlane.f32.xlu2 %v267_v26 }
  0xb2   :  { %v338_v3 = vsel %vm95_vm3, %v300_v62, 0.0 }
  0xb7   :  { %235 = vadd.xlane.f32.xlu1 %v234_v30 }
  0xb8   :  { %312 = vadd.xlane.f32.xlu0 %v311_v33 }
  0xb9   :  { %318 = vadd.xlane.f32.xlu2 %v317_v35 }
  0xbf   :  { %247 = vadd.xlane.f32.xlu1 %v246_v38 }
  0xc0   :  { %321 = vadd.xlane.f32.xlu0 %v320_v40 }
  0xc1   :  { %336 = vadd.xlane.f32.xlu2 %v335_v43 }
  0xc7   :  { %315 = vadd.xlane.f32.xlu1 %v314_v50 }
  0xc8   :  { %330 = vadd.xlane.f32.xlu0 %v329_v53 }
  0xc9   :  { %327 = vadd.xlane.f32.xlu2 %v326_v55 }
  0xcf   :  { %324 = vadd.xlane.f32.xlu1 %v323_v60 }
  0xd0   :  { %271 = vadd.xlane.f32.xlu0 %v270_v59 }
  0xd1   :  { %259 = vadd.xlane.f32.xlu2 %v258_v36 }
  0xd7   :  { %333 = vadd.xlane.f32.xlu1 %v332_v4 }
  0xd8   :  { %339 = vadd.xlane.f32.xlu0 %v338_v3 }
  0xd9   :  { %345 = vadd.xlane.f32.xlu2 %v344_v5 }
  0xdf   :  { %342 = vadd.xlane.f32.xlu1 %v341_v10 }
  0xe0   :  { %348 = vadd.xlane.f32.xlu0 %v347_v11 }
  0xe7   :  { %351 = vadd.xlane.f32.xlu1 %v350_v13 }
 0x103   :  { %v227_v14 = vpop.xlane.xlu0 %226 }
 0x104   :  { %v239_v15 = vpop.xlane.xlu2 %238  ;;  %v273_v16 = vmul.f32 0.03125, %v227_v14 }
 0x105   :  { %v307_v17 = vpop.xlane.xlu1 %306  ;;  %v1051_v13 = vmul.f32 0.03125, %v239_v15 }
 0x106   :  { %v369_v19 = vmul.f32 %v273_v16, %v273_v16  ;;  %v353_v21 = vmul.f32 0.03125, %v307_v17  ;;  %v401_v44 = vsub.f32 %v896_v41, %v273_v16 }
 0x108   :  { %v385_v23 = vsub.f32 %v353_v21, %v369_v19  ;;  %v373_v19 = vmul.f32 %v1051_v13, %v1051_v13 }
 0x10a   :  { %v417_v24 = vadd.f32 1e-05, %v385_v23 }
 0x10b   :  { %v1022_v25 = vpop.xlane.xlu0 %262 }
 0x10c   :  { %761 = vrsqrt.f32 %v417_v24  ;;  %v1024_v26 = vpop.xlane.xlu2 %250  ;;  %vm439_vm2 = vweird.f32 %v417_v24 }
 0x112   :  { %v762_v28 = vpop.eup %761  ;;  %v1026_v29 = vpop.xlane.xlu1 %265 }
 0x113   :  { %v434_v30 = vmul.f32 %v762_v28, %v417_v24  ;;  %v230_v31 = vpop.xlane.xlu0 %229  ;;  %vm440_vm1 = vweird.f32 %v762_v28 }
 0x114   :  { %v242_v32 = vpop.xlane.xlu2 %241  ;;  %v274_v38 = vmul.f32 0.03125, %v230_v31  ;;  %vm441_vm3 = vmor %vm439_vm2, %vm440_vm1 }
 0x115   :  { %v435_v33 = vmul.f32 %v762_v28, %v434_v30 }
 0x116   :  { %v370_v47 = vmul.f32 %v274_v38, %v274_v38  ;;  %v402_v24 = vsub.f32 %v922_v63, %v274_v38 }
 0x117   :  { %v436_v35 = vmul.f32 0.5, %v435_v33 }
 0x119   :  { %v437_v37 = vsub.f32 1.5, %v436_v35 }
 0x11a   :  { %v233_v39 = vpop.xlane.xlu1 %232 }
 0x11b   :  { %v1028_v40 = vpop.xlane.xlu0 %253  ;;  %v438_v43 = vmul.f32 %v762_v28, %v437_v37  ;;  %v1047_v62 = vmul.f32 0.03125, %v233_v39  ;;  %v1059_v39 = vmul.f32 0.03125, %v242_v32 }
 0x11c   :  { %v310_v45 = vpop.xlane.xlu2 %309 }
 0x11d   :  { %v354_v48 = vmul.f32 0.03125, %v310_v45  ;;  %v442_v49 = vsel %vm441_vm3, %v762_v28, %v438_v43  ;;  %v371_v5 = vmul.f32 %v1047_v62, %v1047_v62  ;;  %v374_v63 = vmul.f32 %v1059_v39, %v1059_v39 }
 0x11e   :  { %v593_v50 = vmul.f32 %v442_v49, %v401_v44 }
 0x11f   :  { %v386_v53 = vsub.f32 %v354_v48, %v370_v47 }
 0x120   :  { %v613_v55 = vmul.f32 %v1034_v46, %v593_v50 }
 0x121   :  { %v418_v41 = vadd.f32 1e-05, %v386_v53 }
 0x122   :  { %v1042_v58 = vpop.xlane.xlu1 %256  ;;  %v633_v59 = vadd.f32 %v1039_v51, %v613_v55 }
 0x123   :  { %763 = vrsqrt.f32 %v418_v41  ;;  %v245_v60 = vpop.xlane.xlu0 %244  ;;  %vm449_vm5 = vweird.f32 %v418_v41 }
 0x124   :  { %v1045_v36 = vpop.xlane.xlu2 %268  ;;  %649 = vxpose.xlu2.b32.start [1/16] (narrow) %v633_v59, 32 }
 0x129   :  { %v764_v0 = vpop.eup %763 }
 0x12a   :  { %v444_v2 = vmul.f32 %v764_v0, %v418_v41  ;;  %v236_v3 = vpop.xlane.xlu1 %235  ;;  %vm450_vm4 = vweird.f32 %v764_v0 }
 0x12b   :  { %v313_v4 = vpop.xlane.xlu0 %312  ;;  %vm451_vm6 = vmor %vm449_vm5, %vm450_vm4  ;;  %v1056_v15 = vmul.f32 0.03125, %v236_v3 }
 0x12c   :  { %v445_v6 = vmul.f32 %v764_v0, %v444_v2  ;;  %v355_v8 = vmul.f32 0.03125, %v313_v4  ;;  %v319_v10 = vpop.xlane.xlu2 %318 }
 0x12d   :  { %v357_v16 = vmul.f32 0.03125, %v319_v10  ;;  %v372_v48 = vmul.f32 %v1056_v15, %v1056_v15 }
 0x12e   :  { %v446_v11 = vmul.f32 0.5, %v445_v6  ;;  %v387_v12 = vsub.f32 %v355_v8, %v371_v5  ;;  %v1075_v5 = vmul.f32 0.03125, %v245_v60 }
 0x12f   :  { %v389_v28 = vsub.f32 %v357_v16, %v373_v19 }
 0x130   :  { %v447_v14 = vsub.f32 1.5, %v446_v11  ;;  %v419_v17 = vadd.f32 1e-05, %v387_v12  ;;  %v375_v8 = vmul.f32 %v1075_v5, %v1075_v5  ;;  %v403_v12 = vsub.f32 %v934_v7, %v1047_v62 }
 0x131   :  { %v1061_v43 = vadd.f32 1e-05, %v389_v28 }
 0x132   :  { %v448_v21 = vmul.f32 %v764_v0, %v447_v14  ;;  %765 = vrsqrt.f32 %v419_v17  ;;  %v248_v23 = vpop.xlane.xlu1 %247  ;;  %vm459_vm8 = vweird.f32 %v419_v17 }
 0x133   :  { %v322_v31 = vpop.xlane.xlu0 %321  ;;  %767 = vrsqrt.f32 %v1061_v43  ;;  %v1084_v19 = vmul.f32 0.03125, %v248_v23  ;;  %vm479_vm14 = vweird.f32 %v1061_v43 }
 0x134   :  { %v452_v30 = vsel %vm451_vm6, %v764_v0, %v448_v21  ;;  %v358_v44 = vmul.f32 0.03125, %v322_v31  ;;  %v1068_v50 = vpop.xlane.xlu2 %336  ;;  %v682_v31 = vld [vmem:[%s1311_s5 + $0x8] sm:$0xff] }
 0x135   :  { %v594_v33 = vmul.f32 %v452_v30, %v402_v24  ;;  %v376_v23 = vmul.f32 %v1084_v19, %v1084_v19 }
 0x136   :  { %v390_v32 = vsub.f32 %v358_v44, %v374_v63 }
 0x137   :  { %v614_v35 = vmul.f32 %v1034_v46, %v594_v33 }
 0x138   :  { %v766_v37 = vpop.eup %765  ;;  %v1071_v2 = vadd.f32 1e-05, %v390_v32 }
 0x139   :  { %v454_v45 = vmul.f32 %v766_v37, %v419_v17  ;;  %v634_v47 = vadd.f32 %v1039_v51, %v614_v35  ;;  %vm460_vm7 = vweird.f32 %v766_v37  ;;  %v1073_v4 = vpop.eup %767 }
 0x13a   :  { %v316_v38 = vpop.xlane.xlu1 %315  ;;  %vm461_vm9 = vmor %vm459_vm8, %vm460_vm7  ;;  %v474_v14 = vmul.f32 %v1073_v4, %v1061_v43  ;;  %vm480_vm12 = vweird.f32 %v1073_v4  ;;  %vm489_vm1 = vweird.f32 %v1071_v2 }
 0x13b   :  { %v455_v49 = vmul.f32 %v766_v37, %v454_v45  ;;  %v356_v53 = vmul.f32 0.03125, %v316_v38  ;;  %650 = vxpose.xlu2.b32.cont [2/16] (narrow) %v634_v47, 32  ;;  %vm1128_vm15 = vmor %vm479_vm14, %vm480_vm12 }
 0x13c   :  { %v328_v16 = vpop.xlane.xlu2 %327  ;;  %v475_v33 = vmul.f32 %v1073_v4, %v474_v14 }
 0x13d   :  { %v456_v55 = vmul.f32 0.5, %v455_v49  ;;  %v388_v41 = vsub.f32 %v356_v53, %v372_v48  ;;  %v360_v28 = vmul.f32 0.03125, %v328_v16  ;;  %v331_v48 = vpop.xlane.xlu0 %330  ;;  %v1102_v53 = vmul.f32 0.03125, %v1024_v26  ;;  %v681_v26 = vld [vmem:[%s1311_s5] sm:$0xff] }
 0x13e   :  { %v476_v63 = vmul.f32 0.5, %v475_v33  ;;  %v684_v33 = vld [vmem:[%s1311_s5 + $0x18] sm:$0xff] }
 0x13f   :  { %v457_v59 = vsub.f32 1.5, %v456_v55  ;;  %v420_v0 = vadd.f32 1e-05, %v388_v41  ;;  %v392_v47 = vsub.f32 %v360_v28, %v376_v23  ;;  %v361_v55 = vmul.f32 0.03125, %v331_v48 }
 0x140   :  { %v477_v41 = vsub.f32 1.5, %v476_v63  ;;  %v363_v48 = vmul.f32 0.03125, %v1068_v50 }
 0x141   :  { %v458_v3 = vmul.f32 %v766_v37, %v457_v59  ;;  %769 = vrsqrt.f32 %v420_v0  ;;  %v1104_v32 = vadd.f32 1e-05, %v392_v47  ;;  %vm469_vm11 = vweird.f32 %v420_v0 }
 0x142   :  { %v325_v6 = vpop.xlane.xlu1 %324  ;;  %771 = vrsqrt.f32 %v1071_v2  ;;  %v478_v14 = vmul.f32 %v1073_v4, %v477_v41 }
 0x143   :  { %v359_v10 = vmul.f32 0.03125, %v325_v6  ;;  %v462_v11 = vsel %vm461_vm9, %v766_v37, %v458_v3  ;;  %v822_v37 = vmov 0   ;;  %vm509_vm7 = vweird.f32 %v1104_v32 }
 0x144   :  { %v595_v21 = vmul.f32 %v462_v11, %v403_v12  ;;  %757 = vset.pattern.permute.xlu1 %v822_v37  ;;  %756 = vset.pattern.permute.xlu0 %v822_v37  ;;  %v404_v11 = vsub.f32 %v961_v27, %v1056_v15  ;;  %v482_v43 = vsel %vm1128_vm15, %v1073_v4, %v478_v14 }
 0x145   :  { %v391_v60 = vsub.f32 %v359_v10, %v375_v8  ;;  %692 = vperm.xlu1 %757, %v682_v31   ;;  %v377_v8 = vmul.f32 %v1102_v53, %v1102_v53  ;;  %v683_v10 = vld [vmem:[%s1311_s5 + $0x10] sm:$0xff]  ;;  %687 = vperm.xlu0 %756, %v681_v26  }
 0x146   :  { %v615_v7 = vmul.f32 %v1034_v46, %v595_v21 }
 0x147   :  { %v770_v17 = vpop.eup %769  ;;  %v1086_v30 = vadd.f32 1e-05, %v391_v60  ;;  %v393_v12 = vsub.f32 %v361_v55, %v377_v8 }
 0x148   :  { %v464_v24 = vmul.f32 %v770_v17, %v420_v0  ;;  %v1093_v62 = vpop.eup %771  ;;  %v635_v44 = vadd.f32 %v1039_v51, %v615_v7  ;;  %vm470_vm10 = vweird.f32 %v770_v17  ;;  %v1125_v0 = vmul.f32 0.03125, %v1028_v40 }
 0x149   :  { %773 = vrsqrt.f32 %v1086_v30  ;;  %v484_v38 = vmul.f32 %v1093_v62, %v1071_v2  ;;  %vm471_vm13 = vmor %vm469_vm11, %vm470_vm10  ;;  %v1132_v15 = vadd.f32 1e-05, %v393_v12  ;;  %vm490_vm0 = vweird.f32 %v1093_v62 }
 0x14a   :  { %v465_v35 = vmul.f32 %v770_v17, %v464_v24  ;;  %651 = vxpose.xlu2.b32.cont [3/16] (narrow) %v635_v44, 32  ;;  %775 = vrsqrt.f32 %v1104_v32  ;;  %v334_v21 = vpop.xlane.xlu1 %333  ;;  %v378_v37 = vmul.f32 %v1125_v0, %v1125_v0  ;;  %v1148_v44 = vpop.xlane.xlu0 %271  ;;  %vm491_vm2 = vmor %vm489_vm1, %vm490_vm0  ;;  %vm499_vm4 = vweird.f32 %v1086_v30 }
 0x14b   :  { %v485_v59 = vmul.f32 %v1093_v62, %v484_v38  ;;  %v362_v31 = vmul.f32 0.03125, %v334_v21  ;;  %777 = vrsqrt.f32 %v1132_v15  ;;  %vm519_vm10 = vweird.f32 %v1132_v15 }
 0x14c   :  { %v466_v45 = vmul.f32 0.5, %v465_v35  ;;  %v405_v35 = vsub.f32 %v898_v42, %v1051_v13  ;;  %v1157_v13 = vmul.f32 0.03125, %v1042_v58  ;;  %v406_v58 = vsub.f32 %v920_v61, %v1059_v39 }
 0x14d   :  { %697 = vperm.xlu1 %757, %v683_v10   ;;  %v486_v16 = vmul.f32 0.5, %v485_v59  ;;  %v260_v10 = vpop.xlane.xlu2 %259 }
 0x14e   :  { %v467_v49 = vsub.f32 1.5, %v466_v45  ;;  %v394_v45 = vsub.f32 %v362_v31, %v378_v37  ;;  %v597_v63 = vmul.f32 %v482_v43, %v405_v35  ;;  %v379_v2 = vmul.f32 %v1157_v13, %v1157_v13 }
 0x14f   :  { %v1107_v6 = vpop.eup %773  ;;  %v487_v7 = vsub.f32 1.5, %v486_v16  ;;  %v1178_v61 = vmul.f32 0.03125, %v260_v10 }
 0x150   :  { %v468_v3 = vmul.f32 %v770_v17, %v467_v49  ;;  %v494_v60 = vmul.f32 %v1107_v6, %v1086_v30  ;;  %v1142_v23 = vpop.eup %775  ;;  %v1161_v49 = vadd.f32 1e-05, %v394_v45  ;;  %v617_v55 = vmul.f32 %v1034_v46, %v597_v63 }
 0x151   :  { %v488_v38 = vmul.f32 %v1093_v62, %v487_v7  ;;  %v504_v4 = vmul.f32 %v1142_v23, %v1104_v32  ;;  %v1166_v8 = vpop.eup %777  ;;  %v395_v50 = vsub.f32 %v363_v48, %v379_v2  ;;  %vm500_vm3 = vweird.f32 %v1107_v6 }
 0x152   :  { %v472_v24 = vsel %vm471_vm13, %v770_v17, %v468_v3  ;;  %v495_v17 = vmul.f32 %v1107_v6, %v494_v60  ;;  %779 = vrsqrt.f32 %v1161_v49  ;;  %v637_v26 = vadd.f32 %v1039_v51, %v617_v55  ;;  %v340_v16 = vpop.xlane.xlu0 %339  ;;  %vm501_vm5 = vmor %vm499_vm4, %vm500_vm3 }
 0x153   :  { %v596_v28 = vmul.f32 %v472_v24, %v404_v11  ;;  %v505_v41 = vmul.f32 %v1142_v23, %v504_v4  ;;  %v492_v3 = vsel %vm491_vm2, %v1093_v62, %v488_v38  ;;  %v514_v14 = vmul.f32 %v1166_v8, %v1132_v15 }
 0x154   :  { %v496_v42 = vmul.f32 0.5, %v495_v17  ;;  %v598_v11 = vmul.f32 %v492_v3, %v406_v58  ;;  %v1181_v39 = vadd.f32 1e-05, %v395_v50  ;;  %v380_v60 = vmul.f32 %v1178_v61, %v1178_v61 }
 0x155   :  { %v616_v40 = vmul.f32 %v1034_v46, %v596_v28  ;;  %702 = vperm.xlu1 %757, %v684_v33   ;;  %v506_v12 = vmul.f32 0.5, %v505_v41  ;;  %v364_v21 = vmul.f32 0.03125, %v340_v16  ;;  %v515_v27 = vmul.f32 %v1166_v8, %v514_v14  ;;  %v346_v58 = vpop.xlane.xlu2 %345 }
 0x156   :  { %v497_v59 = vsub.f32 1.5, %v496_v42  ;;  %v618_v24 = vmul.f32 %v1034_v46, %v598_v11  ;;  %v407_v7 = vsub.f32 %v950_v20, %v1075_v5  ;;  %781 = vrsqrt.f32 %v1181_v39 }
 0x157   :  { %v636_v47 = vadd.f32 %v1039_v51, %v616_v40  ;;  %v507_v28 = vsub.f32 1.5, %v506_v12  ;;  %v396_v30 = vsub.f32 %v364_v21, %v380_v60  ;;  %vm510_vm6 = vweird.f32 %v1142_v23 }
 0x158   :  { %v498_v62 = vmul.f32 %v1107_v6, %v497_v59  ;;  %v1188_v33 = vpop.eup %779  ;;  %v638_v17 = vadd.f32 %v1039_v51, %v618_v24  ;;  %v516_v35 = vmul.f32 0.5, %v515_v27  ;;  %v1199_v45 = vmul.f32 0.03125, %v1022_v25  ;;  %vm511_vm8 = vmor %vm509_vm7, %vm510_vm6 }
 0x159   :  { %652 = vxpose.xlu2.b32.cont [4/16] (narrow) %v636_v47, 32  ;;  %v508_v43 = vmul.f32 %v1142_v23, %v507_v28  ;;  %v524_v37 = vmul.f32 %v1188_v33, %v1161_v49  ;;  %v1202_v20 = vadd.f32 1e-05, %v396_v30  ;;  %v408_v48 = vsub.f32 %v971_v34, %v1084_v19 }
 0x15a   :  { %v502_v31 = vsel %vm501_vm5, %v1107_v6, %v498_v62  ;;  %v343_v6 = vpop.xlane.xlu1 %342  ;;  %v517_v63 = vsub.f32 1.5, %v516_v35  ;;  %v381_v25 = vmul.f32 %v1199_v45, %v1199_v45  ;;  %vm520_vm9 = vweird.f32 %v1166_v8  ;;  %v349_v24 = vpop.xlane.xlu0 %348 }
 0x15b   :  { %v599_v40 = vmul.f32 %v502_v31, %v407_v7  ;;  %v365_v5 = vmul.f32 0.03125, %v343_v6  ;;  %v525_v38 = vmul.f32 %v1188_v33, %v524_v37  ;;  %v512_v4 = vsel %vm511_vm8, %v1142_v23, %v508_v43  ;;  %vm521_vm11 = vmor %vm519_vm10, %vm520_vm9 }
 0x15c   :  { %v1207_v42 = vpop.eup %781  ;;  %783 = vrsqrt.f32 %v1202_v20  ;;  %v600_v41 = vmul.f32 %v512_v4, %v408_v48  ;;  %v518_v3 = vmul.f32 %v1166_v8, %v517_v63  ;;  %v1220_v2 = vmul.f32 0.03125, %v1026_v29 }
 0x15d   :  { %v619_v47 = vmul.f32 %v1034_v46, %v599_v40  ;;  %v397_v32 = vsub.f32 %v365_v5, %v381_v25  ;;  %v534_v59 = vmul.f32 %v1207_v42, %v1181_v39  ;;  %v526_v23 = vmul.f32 0.5, %v525_v38 }
 0x15e   :  { %v366_v34 = vmul.f32 0.03125, %v346_v58  ;;  %v620_v10 = vmul.f32 %v1034_v46, %v600_v41  ;;  %v522_v11 = vsel %vm521_vm11, %v1166_v8, %v518_v3  ;;  %v409_v29 = vsub.f32 %v911_v54, %v1102_v53 }
 0x15f   :  { %v639_v55 = vadd.f32 %v1039_v51, %v619_v47  ;;  %v1223_v19 = vadd.f32 1e-05, %v397_v32  ;;  %v535_v50 = vmul.f32 %v1207_v42, %v534_v59  ;;  %v382_v14 = vmul.f32 %v1220_v2, %v1220_v2 }
 0x160   :  { %v640_v62 = vadd.f32 %v1039_v51, %v620_v10  ;;  %v601_v16 = vmul.f32 %v522_v11, %v409_v29  ;;  %vm530_vm12 = vweird.f32 %v1188_v33  ;;  %vm529_vm13 = vweird.f32 %v1161_v49 }
 0x161   :  { %653 = vxpose.xlu2.b32.cont [5/16] (narrow) %v637_v26, 32  ;;  %v527_v26 = vsub.f32 1.5, %v526_v23  ;;  %v398_v15 = vsub.f32 %v366_v34, %v382_v14  ;;  %785 = vrsqrt.f32 %v1223_v19  ;;  %v536_v60 = vmul.f32 0.5, %v535_v50  ;;  %vm531_vm14 = vmor %vm529_vm13, %vm530_vm12 }
 0x162   :  { %v1228_v12 = vpop.eup %783  ;;  %v1242_v54 = vmul.f32 0.03125, %v1045_v36  ;;  %v367_v28 = vmul.f32 0.03125, %v349_v24  ;;  %v621_v27 = vmul.f32 %v1034_v46, %v601_v16  ;;  %v410_v40 = vsub.f32 %v936_v9, %v1125_v0  ;;  %v352_v5 = vpop.xlane.xlu1 %351 }
 0x163   :  { %v528_v21 = vmul.f32 %v1188_v33, %v527_v26  ;;  %v544_v8 = vmul.f32 %v1228_v12, %v1202_v20  ;;  %v1244_v53 = vadd.f32 1e-05, %v398_v15  ;;  %v537_v31 = vsub.f32 1.5, %v536_v60 }
 0x164   :  { %v383_v49 = vmul.f32 %v1242_v54, %v1242_v54  ;;  %v641_v43 = vadd.f32 %v1039_v51, %v621_v27  ;;  %vm540_vm15 = vweird.f32 %v1207_v42  ;;  %v1259_v47 = vmul.f32 0.03125, %v1148_v44 }
 0x165   :  { %v545_v7 = vmul.f32 %v1228_v12, %v544_v8  ;;  %v532_v30 = vsel %vm531_vm14, %v1188_v33, %v528_v21  ;;  %787 = vrsqrt.f32 %v1244_v53  ;;  %v538_v37 = vmul.f32 %v1207_v42, %v537_v31 }
 0x166   :  { %v399_v36 = vsub.f32 %v367_v28, %v383_v49  ;;  %v602_v35 = vmul.f32 %v532_v30, %v410_v40  ;;  %vm539_vm0 = vweird.f32 %v1181_v39  ;;  %v384_v9 = vmul.f32 %v1259_v47, %v1259_v47 }
 0x167   :  { %v546_v6 = vmul.f32 0.5, %v545_v7  ;;  %vm541_vm1 = vmor %vm539_vm0, %vm540_vm15  ;;  %v368_v63 = vmul.f32 0.03125, %v352_v5  ;;  %v411_v44 = vsub.f32 %v947_v18, %v1157_v13  ;;  %vm549_vm2 = vweird.f32 %v1202_v20 }
 0x168   :  { %v1264_v0 = vadd.f32 1e-05, %v399_v36  ;;  %v622_v38 = vmul.f32 %v1034_v46, %v602_v35  ;;  %v542_v48 = vsel %vm541_vm1, %v1207_v42, %v538_v37  ;;  %vm550_vm3 = vweird.f32 %v1228_v12 }
 0x169   :  { %654 = vxpose.xlu2.b32.cont [6/16] (narrow) %v638_v17, 32  ;;  %v786_v17 = vpop.eup %785  ;;  %v547_v4 = vsub.f32 1.5, %v546_v6  ;;  %v400_v39 = vsub.f32 %v368_v63, %v384_v9  ;;  %v603_v41 = vmul.f32 %v542_v48, %v411_v44  ;;  %vm551_vm4 = vmor %vm549_vm2, %vm550_vm3  ;;  %v412_v10 = vsub.f32 %v995_v57, %v1178_v61 }
 0x16a   :  { %v554_v33 = vmul.f32 %v786_v17, %v1223_v19  ;;  %789 = vrsqrt.f32 %v1264_v0  ;;  %vm560_vm5 = vweird.f32 %v786_v17  ;;  %vm559_vm6 = vweird.f32 %v1223_v19 }
 0x16b   :  { %v788_v32 = vpop.eup %787  ;;  %v548_v3 = vmul.f32 %v1228_v12, %v547_v4  ;;  %v432_v42 = vadd.f32 1e-05, %v400_v39  ;;  %v623_v18 = vmul.f32 %v1034_v46, %v603_v41  ;;  %vm561_vm7 = vmor %vm559_vm6, %vm560_vm5  ;;  %v413_v57 = vsub.f32 %v908_v52, %v1199_v45 }
 0x16c   :  { %v555_v25 = vmul.f32 %v786_v17, %v554_v33  ;;  %v564_v59 = vmul.f32 %v788_v32, %v1244_v53  ;;  %vm570_vm8 = vweird.f32 %v788_v32  ;;  %vm569_vm9 = vweird.f32 %v1244_v53 }
 0x16d   :  { %v552_v58 = vsel %vm551_vm4, %v1228_v12, %v548_v3  ;;  %791 = vrsqrt.f32 %v432_v42  ;;  %v643_v50 = vadd.f32 %v1039_v51, %v623_v18  ;;  %vm571_vm10 = vmor %vm569_vm9, %vm570_vm8  ;;  %v414_v30 = vsub.f32 %v924_v1, %v1220_v2 }
 0x16e   :  { %v556_v23 = vmul.f32 0.5, %v555_v25  ;;  %v565_v13 = vmul.f32 %v788_v32, %v564_v59  ;;  %v604_v26 = vmul.f32 %v552_v58, %v412_v10  ;;  %vm579_vm12 = vweird.f32 %v1264_v0 }
 0x16f   :  { %vm589_vm14 = vweird.f32 %v432_v42  ;;  %v416_v33 = vsub.f32 %v993_v56, %v1259_v47 }
 0x170   :  { %v557_v20 = vsub.f32 1.5, %v556_v23  ;;  %v790_v34 = vpop.eup %789  ;;  %v566_v11 = vmul.f32 0.5, %v565_v13  ;;  %v624_v15 = vmul.f32 %v1034_v46, %v604_v26 }
 0x171   :  { %655 = vxpose.xlu2.b32.cont [7/16] (narrow) %v639_v55, 32  ;;  %v642_v55 = vadd.f32 %v1039_v51, %v622_v38  ;;  %v574_v14 = vmul.f32 %v790_v34, %v1264_v0  ;;  %vm580_vm11 = vweird.f32 %v790_v34 }
 0x172   :  { %v558_v29 = vmul.f32 %v786_v17, %v557_v20  ;;  %v567_v12 = vsub.f32 1.5, %v566_v11  ;;  %v644_v61 = vadd.f32 %v1039_v51, %v624_v15  ;;  %vm581_vm13 = vmor %vm579_vm12, %vm580_vm11 }
 0x173   :  { %v792_v60 = vpop.eup %791 }
 0x174   :  { %v562_v16 = vsel %vm561_vm7, %v786_v17, %v558_v29  ;;  %v568_v8 = vmul.f32 %v788_v32, %v567_v12  ;;  %v584_v28 = vmul.f32 %v792_v60, %v432_v42  ;;  %vm590_vm15 = vweird.f32 %v792_v60 }
 0x175   :  { %v605_v21 = vmul.f32 %v562_v16, %v413_v57  ;;  %vm591_vm0 = vmor %vm589_vm14, %vm590_vm15 }
 0x176   :  { %v585_v31 = vmul.f32 %v792_v60, %v584_v28  ;;  %v572_v7 = vsel %vm571_vm10, %v788_v32, %v568_v8 }
 0x177   :  { %v625_v19 = vmul.f32 %v1034_v46, %v605_v21  ;;  %v606_v45 = vmul.f32 %v572_v7, %v414_v30 }
 0x178   :  { %v586_v40 = vmul.f32 0.5, %v585_v31 }
 0x179   :  { %656 = vxpose.xlu2.b32.cont [8/16] (narrow) %v640_v62, 32  ;;  %v575_v62 = vmul.f32 %v790_v34, %v574_v14  ;;  %v645_v52 = vadd.f32 %v1039_v51, %v625_v19  ;;  %v626_v53 = vmul.f32 %v1034_v46, %v606_v45 }
 0x17a   :  { %v587_v49 = vsub.f32 1.5, %v586_v40 }
 0x17b   :  { %v576_v24 = vmul.f32 0.5, %v575_v62  ;;  %v646_v1 = vadd.f32 %v1039_v51, %v626_v53 }
 0x17c   :  { %v588_v35 = vmul.f32 %v792_v60, %v587_v49 }
 0x17d   :  { %v577_v27 = vsub.f32 1.5, %v576_v24 }
 0x17e   :  { %v592_v6 = vsel %vm591_vm0, %v792_v60, %v588_v35 }
 0x17f   :  { %v578_v17 = vmul.f32 %v790_v34, %v577_v27  ;;  %v608_v9 = vmul.f32 %v592_v6, %v416_v33 }
 0x181   :  { %657 = vxpose.xlu2.b32.cont [9/16] (narrow) %v641_v43, 32  ;;  %v582_v36 = vsel %vm581_vm13, %v790_v34, %v578_v17  ;;  %v415_v43 = vsub.f32 %v952_v22, %v1242_v54  ;;  %v628_v22 = vmul.f32 %v1034_v46, %v608_v9 }
 0x183   :  { %v607_v2 = vmul.f32 %v582_v36, %v415_v43  ;;  %v648_v54 = vadd.f32 %v1039_v51, %v628_v22 }
 0x185   :  { %v627_v37 = vmul.f32 %v1034_v46, %v607_v2 }
 0x187   :  { %v647_v5 = vadd.f32 %v1039_v51, %v627_v37 }
 0x189   :  { %658 = vxpose.xlu2.b32.cont [10/16] (narrow) %v642_v55, 32 }
 0x191   :  { %659 = vxpose.xlu2.b32.cont [11/16] (narrow) %v643_v50, 32 }
 0x199   :  { %660 = vxpose.xlu2.b32.cont [12/16] (narrow) %v644_v61, 32 }
 0x1a1   :  { %661 = vxpose.xlu2.b32.cont [13/16] (narrow) %v645_v52, 32 }
 0x1a9   :  { %662 = vxpose.xlu2.b32.cont [14/16] (narrow) %v646_v1, 32 }
 0x1b1   :  { %663 = vxpose.xlu2.b32.cont [15/16] (narrow) %v647_v5, 32 }
 0x1b7   :  { %v693_v63 = vpop.permute.xlu1 %692  ;;  %v688_v48 = vpop.permute.xlu0 %687 }
 0x1b9   :  { %664 = vxpose.xlu2.b32.end [16/16] (narrow) %v648_v54, 32 }
 0x1bf   :  { %v698_v4 = vpop.permute.xlu1 %697 }
 0x1c7   :  { %v703_v56 = vpop.permute.xlu1 %702 }
 0x1da   :  { %v665_v0 = vpop.trf.xlu2 }
 0x1db   :  { %v705_v44 = vmul.f32 %v688_v48, %v665_v0 }
 0x1e2   :  { %v666_v38 = vpop.trf.xlu2 }
 0x1e3   :  { %v706_v32 = vmul.f32 %v693_v63, %v666_v38 }
 0x1e5   :  { %v709_v55 = vadd.f32 %v706_v32, %v705_v44 }
 0x1ea   :  { %v667_v25 = vpop.trf.xlu2 }
 0x1eb   :  { %v707_v39 = vmul.f32 %v698_v4, %v667_v25 }
 0x1ed   :  { %v710_v41 = vadd.f32 %v709_v55, %v707_v39 }
 0x1f2   :  { %v668_v47 = vpop.trf.xlu2 }
 0x1f3   :  { %v708_v59 = vmul.f32 %v703_v56, %v668_v47 }
 0x1f5   :  { %v711_v3 = vadd.f32 %v710_v41, %v708_v59 }
 0x1f7   :  { %v712_v23 = vrot.slane %v711_v3, 4 }
 0x1f9   :  { %v713_v46 = vadd.f32 %v712_v23, %v711_v3 }
 0x1fb   :  { %v714_v42 = vrot.slane %v713_v46, 2 }
 0x1fd   :  { %v715_v51 = vadd.f32 %v714_v42, %v713_v46 }
 0x1ff   :  { %v716_v18 = vrot.slane %v715_v51, 1 }
 0x201   :  { %v717_v13 = vadd.f32 %v716_v18, %v715_v51 }
 0x203   :  { %718 = vst [vmem:[%s1312_s6] sm:$0x1] %v717_v13 }
 0x204   :  { %723 = vsyncpa [#allocation3], 1 }

</bundles_post_ra>
